<compile_context>
chip_gen: v6e
topology: v6e:2x2x1
jax: 0.10.0
libtpu: 0.0.40
codegen_flags: <defaults>
</compile_context>

<pallas_src>
import math
import functools

import jax
import jax.numpy as jnp
from jax import lax
from jax.experimental import pallas as pl
from jax.experimental.pallas import tpu as pltpu


# ---------------------------------------------------------------------------
# "Module init": positional-encoding buffer pe[max_len, 1, d_model]
# ---------------------------------------------------------------------------
def make_positional_encoding(d_model: int, max_len: int) -> jax.Array:
    position = jnp.arange(max_len, dtype=jnp.float32)[:, None]            # (max_len, 1)
    div_term = jnp.exp(
        jnp.arange(0, d_model, 2, dtype=jnp.float32) * (-math.log(10000.0) / d_model)
    )                                                                      # (d_model//2,)
    angles = position * div_term                                           # (max_len, d_model//2)
    pe = jnp.zeros((max_len, 1, d_model), dtype=jnp.float32)
    pe = pe.at[:, 0, 0::2].set(jnp.sin(angles))
    pe = pe.at[:, 0, 1::2].set(jnp.cos(angles))
    return pe


# ---------------------------------------------------------------------------
# Counter-based hash (lowbias32-style) -- pure int32 ops, safe on TPU + interpret.
# ---------------------------------------------------------------------------
_MIX_C1 = 0x7FEB352D                      # fits in int32
_MIX_C2 = 0x846CA68B - (1 << 32)          # signed int32 view of the u32 constant


def _srl(x, k):
    """Logical right shift on an int32 array (arithmetic shift + mask)."""
    return (x >> k) & jnp.int32((1 << (32 - k)) - 1)


def _mix32(x):
    x = x ^ _srl(x, 16)
    x = x * jnp.int32(_MIX_C1)
    x = x ^ _srl(x, 15)
    x = x * jnp.int32(_MIX_C2)
    x = x ^ _srl(x, 16)
    return x


# ---------------------------------------------------------------------------
# Pallas kernels
# ---------------------------------------------------------------------------
def _pe_add_eval_kernel(x_ref, pe_ref, o_ref):
    # x: (TS, B, D), pe: (TS, 1, D) -> broadcast-add over batch; dropout = identity.
    o_ref[...] = (x_ref[...] + pe_ref[...]).astype(o_ref.dtype)


def _pe_add_train_kernel(seed_ref, x_ref, pe_ref, o_ref, *,
                         drop_threshold: int, scale: float):
    ts, b, d = x_ref.shape
    y = x_ref[...] + pe_ref[...]

    # Per-element counter = flattened global (seq, batch, feature) index.  Each
    # grid tile covers a disjoint counter range, so masks differ across tiles.
    tile = pl.program_id(0)
    base = tile * jnp.int32(ts * b * d)
    lin = (lax.broadcasted_iota(jnp.int32, (ts, b, d), 0) * jnp.int32(b * d)
           + lax.broadcasted_iota(jnp.int32, (ts, b, d), 1) * jnp.int32(d)
           + lax.broadcasted_iota(jnp.int32, (ts, b, d), 2))
    bits = _mix32((base + lin) ^ seed_ref[0])          # uniform over all int32

    keep = bits >= jnp.int32(drop_threshold)           # P(drop) == dropout_p
    o_ref[...] = jnp.where(keep, y * scale, jnp.zeros_like(y)).astype(o_ref.dtype)


# ---------------------------------------------------------------------------
# Wrapper (the nn.Module forward)
# ---------------------------------------------------------------------------
def _seq_tile(seq_len: int, batch: int, d_model: int, itemsize: int,
              target_bytes: int = 1 << 20) -> int:
    """~1 MiB per input block: big enough for HBM roofline, small enough that
    2 inputs + 1 output x 2 pipeline buffers stay far under every chip's
    scoped-VMEM default (16 MiB v5e / 32 MiB v6e,v7x)."""
    per_row = batch * d_model * itemsize
    ts = max(1, target_bytes // per_row)
    if ts >= seq_len:
        return seq_len
    if ts >= 8:
        ts -= ts % 8            # sublane-friendly seq tiles
    return ts


def positional_encoder_forward(
    x: jax.Array,
    pe: jax.Array,
    *,
    dropout_p: float = 0.1,
    training: bool = False,
    seed: int = 0,
) -> jax.Array:
    """x: [seq_len, batch, d_model].  Returns dropout(x + pe[:seq_len])."""
    seq_len, batch, d_model = x.shape
    assert pe.shape[0] >= seq_len and pe.shape[2] == d_model

    ts = _seq_tile(seq_len, batch, d_model, x.dtype.itemsize)
    grid = (pl.cdiv(seq_len, ts),)

    # Trailing block dims equal the full (B, D) dims -> valid layout; for
    # production shapes keep D % 128 == 0 and B >= 8 so blocks are lane/sublane
    # dense.  pe is passed whole; its index_map windows the first seq_len rows.
    x_spec = pl.BlockSpec((ts, batch, d_model), lambda i: (i, 0, 0))
    pe_spec = pl.BlockSpec((ts, 1, d_model), lambda i: (i, 0, 0))
    out_spec = pl.BlockSpec((ts, batch, d_model), lambda i: (i, 0, 0))
    out_shape = jax.ShapeDtypeStruct(x.shape, x.dtype)
    cparams = pltpu.CompilerParams(dimension_semantics=("parallel",))

    if (not training) or dropout_p <= 0.0:
        return pl.pallas_call(
            _pe_add_eval_kernel,
            grid=grid,
            in_specs=[x_spec, pe_spec],
            out_specs=out_spec,
            out_shape=out_shape,
            input_output_aliases={0: 0},          # output reuses x's HBM buffer
            compiler_params=cparams,
        )(x, pe)

    p = float(dropout_p)
    if p >= 1.0:                                   # degenerate nn.Dropout(p=1) case
        return jnp.zeros_like(x)

    # Signed threshold: drop iff hashed bits < threshold; P(drop) = p exactly
    # (up to 2**-32), no uint32 overflow even for p -> 1.
    t = min(int(round(p * (1 << 32))), (1 << 32) - 1)
    drop_threshold = t - (1 << 31)
    scale = 1.0 / (1.0 - p)

    seed_arr = jnp.asarray([seed], dtype=jnp.int32)
    kernel = functools.partial(_pe_add_train_kernel,
                               drop_threshold=drop_threshold, scale=scale)
    return pl.pallas_call(
        kernel,
        grid=grid,
        in_specs=[
            pl.BlockSpec(memory_space=pltpu.MemorySpace.SMEM),   # seed scalar
            x_spec,
            pe_spec,
        ],
        out_specs=out_spec,
        out_shape=out_shape,
        input_output_aliases={1: 0},              # x -> output
        compiler_params=cparams,
    )(seed_arr, x, pe)


# ---------------------------------------------------------------------------
# Main
# ---------------------------------------------------------------------------
if __name__ == "__main__":
    SEQ_LEN, BATCH, D_MODEL = 8, 2, 32
    MAX_LEN = 64   # small synthetic max_len (module default is 5000)

    key = jax.random.PRNGKey(0)
    x = jax.random.normal(key, (SEQ_LEN, BATCH, D_MODEL), dtype=jnp.float32)
    pe = make_positional_encoding(D_MODEL, MAX_LEN)
    ref = x + pe[:SEQ_LEN]

    # Eval-mode forward (dropout = identity): exact reference check.
    out_eval = jax.block_until_ready(positional_encoder_forward(x, pe, training=False))
    assert out_eval.shape == x.shape and out_eval.dtype == x.dtype
    assert jnp.allclose(out_eval, ref, atol=1e-6, rtol=1e-6), "eval-mode mismatch"

    # Training-mode forward (in-kernel counter-hash dropout).
    P = 0.1
    out_train = jax.block_until_ready(
        positional_encoder_forward(x, pe, dropout_p=P, training=True, seed=1234))
    assert out_train.shape == x.shape and out_train.dtype == x.dtype
    # Every element is either exactly 0 (dropped) or ref / (1 - p) (kept & rescaled).
    dropped = out_train == 0.0
    kept_ok = jnp.where(dropped, True,
                        jnp.isclose(out_train, ref / (1.0 - P), atol=1e-5, rtol=1e-5))
    assert bool(jnp.all(kept_ok)), "training-mode dropout scaling mismatch"
    assert bool(jnp.any(~dropped)), "dropout dropped everything"

    print("KERNEL_OK")
</pallas_src>

<mosaic_0001>
module attributes {stable_mosaic.version = 11 : i64} {
  func.func @_pe_add_eval_kernel(%arg0: i32, %arg1: memref<8x2x32xf32, #tpu.memory_space<vmem>>, %arg2: memref<8x1x32xf32, #tpu.memory_space<vmem>>, %arg3: memref<8x2x32xf32, #tpu.memory_space<vmem>>) attributes {dimension_semantics = [#tpu.dimension_semantics<parallel>], iteration_bounds = array<i64: 1>, scalar_prefetch = 0 : i64, scratch_operands = 0 : i64, tpu.core_type = #tpu.core_type<tc>, window_params = [{transform_indices = @transform_0, window_bounds = array<i64: 8, 2, 32>}, {transform_indices = @transform_1, window_bounds = array<i64: 8, 1, 32>}, {transform_indices = @transform_2, window_bounds = array<i64: 8, 2, 32>}]} {
    %c0 = arith.constant 0 : index
    %c0_0 = arith.constant 0 : index
    %c0_1 = arith.constant 0 : index
    %0 = vector.load %arg1[%c0, %c0_0, %c0_1] : memref<8x2x32xf32, #tpu.memory_space<vmem>>, vector<8x2x32xf32>
    %c0_2 = arith.constant 0 : index
    %c0_3 = arith.constant 0 : index
    %c0_4 = arith.constant 0 : index
    %1 = vector.load %arg2[%c0_2, %c0_3, %c0_4] : memref<8x1x32xf32, #tpu.memory_space<vmem>>, vector<8x1x32xf32>
    %2 = vector.broadcast %1 : vector<8x1x32xf32> to vector<8x2x32xf32>
    %3 = arith.addf %0, %2 : vector<8x2x32xf32>
    %c0_5 = arith.constant 0 : index
    %c0_6 = arith.constant 0 : index
    %c0_7 = arith.constant 0 : index
    %4 = vector.load %arg3[%c0_5, %c0_6, %c0_7] : memref<8x2x32xf32, #tpu.memory_space<vmem>>, vector<8x2x32xf32>
    tpu.vector_store %arg3[%c0_5, %c0_6, %c0_7], %3 {strides = array<i32>} : memref<8x2x32xf32, #tpu.memory_space<vmem>>, vector<8x2x32xf32>,
    return
  }
  func.func @transform_0(%arg0: i32) -> (i32, i32, i32) {
    %c0_i32 = arith.constant 0 : i32
    %c0_i32_0 = arith.constant 0 : i32
    %c0_i32_1 = arith.constant 0 : i32
    return %arg0, %c0_i32, %c0_i32_0 : i32, i32, i32
  }
  func.func @transform_1(%arg0: i32) -> (i32, i32, i32) {
    %c0_i32 = arith.constant 0 : i32
    %c0_i32_0 = arith.constant 0 : i32
    %c0_i32_1 = arith.constant 0 : i32
    return %arg0, %c0_i32, %c0_i32_0 : i32, i32, i32
  }
  func.func @transform_2(%arg0: i32) -> (i32, i32, i32) {
    %c0_i32 = arith.constant 0 : i32
    %c0_i32_0 = arith.constant 0 : i32
    %c0_i32_1 = arith.constant 0 : i32
    return %arg0, %c0_i32, %c0_i32_0 : i32, i32, i32
  }
}

</mosaic_0001>

<bundles_post_ra>
// kernel: tpu_custom_call.1
= control target key start
LH: loop header
LB: loop body
LE: loop exit
PB: predicated region body
PF: predicated region fallthrough
CT: control target
= control target key end

     0   :  { %7 = vsyncpa [#allocation3], 0  ;;  %s246_s0 = inlined_call_operand.hbm [shape: f32[8,2,32], index: 0, kind: input, shape index: {}, may-alias: {0,2}]   ;;  %s247_s1 = inlined_call_operand.vmem [shape: f32[64,1,32], index: 1, kind: input, shape index: {}]   ;;  %s248_s2 = inlined_call_operand.hbm [shape: f32[8,2,32], index: 2, kind: output, shape index: {}, may-alias: {0,2}]  }
   0x1   :  { %8 = vsyncpa [#allocation4], 0  ;;  %s180_s9 = smov [#allocation2]  }
   0x2   :  { %s14_s10 = sshll.u32 %s180_s9, 4  ;;  %s15_s10 = int_to_ptr.vmem [resolvable:$true] %s14_s10 }
   0x3   :  { %s144_s11 = scalar_lea.vmem %s15_s10, 256  ;;  %p149_p1 = scmp.lt.s32.totalorder %s15_s10, %s15_s10 }
   0x4   :  { %p145_p0 = scmp.ne.s32.totalorder %s15_s10, %s144_s11  ;;  %p150_p2 = scmp.lt.s32.totalorder %s144_s11, %s144_s11 }
   0x6   :  { %p151_p3 = por %p150_p2, %p149_p1 }
   0x8   :  { %p152_p4 = pnand %p151_p3, %p145_p0 }
   0xa   :  { %155 = shalt.err (!%p152_p4)
}
   0xb   :  { %s181_s12 = smov 32   ;;  %s182_s13 = smov 2  }
   0xc   :  { %20 = dma.hbm_to_vmem [thread:$0]  %s246_s0, 256, %s15_s10, [#allocation3], %s181_s12, %s181_s12, %s182_s13  }
   0xd   :  { %176 = dma.done.wait [#allocation3], 256  }
   0xe   :  { %177 = vsyncadd [#allocation3], 4294967040  ;;  %vm98_vm0 = vcmask 254976   ;;  %s183_s16 = smov [#allocation5]   ;;  %v26_v0 = vld [vmem:[#allocation2] sm:$0x3] }
   0xf   :  { %s205_s17 = sshll.u32 %s183_s16, 4  ;;  %v124_v1 = vld [vmem:[%s247_s1] ss:$0 sm:$0xff]  ;;  %v27_v2 = vld [vmem:[#allocation2 + $0x2] sm:$0x3]  ;;  %s113_s17 = int_to_ptr.vmem [resolvable:$true] %s205_s17 }
  0x10   :  { %v90_v3 = vadd.f32 %v124_v1, %v26_v0  ;;  %v125_v4 = vld [vmem:[%s247_s1 + $0x1] ss:$0 sm:$0xff]  ;;  %v28_v5 = vld [vmem:[#allocation2 + $0x4] sm:$0x3]  ;;  %v126_v6 = vld [vmem:[%s247_s1 + $0x2] ss:$0 sm:$0xff]  ;;  %p161_p6 = scmp.lt.s32.totalorder %s113_s17, %s113_s17 }
  0x11   :  { %v91_v7 = vadd.f32 %v125_v4, %v27_v2  ;;  %v92_v8 = vadd.f32 %v126_v6, %v28_v5  ;;  %v29_v9 = vld [vmem:[#allocation2 + $0x6] sm:$0x3]  ;;  %v127_v10 = vld [vmem:[%s247_s1 + $0x3] ss:$0 sm:$0xff]  ;;  %v30_v11 = vld [vmem:[#allocation2 + $0x8] sm:$0x3] }
  0x12   :  { %99 = vst.msk [vmem:[#allocation5] sm:$0x3] %vm98_vm0, %v90_v3  ;;  %v93_v12 = vadd.f32 %v127_v10, %v29_v9  ;;  %v128_v13 = vld [vmem:[%s247_s1 + $0x4] ss:$0 sm:$0xff]  ;;  %v31_v14 = vld [vmem:[#allocation2 + $0xa] sm:$0x3] }
  0x13   :  { %v129_v15 = vld [vmem:[%s247_s1 + $0x5] ss:$0 sm:$0xff]  ;;  %100 = vst.msk [vmem:[#allocation5 + $0x2] sm:$0x3] %vm98_vm0, %v91_v7  ;;  %101 = vst.msk [vmem:[#allocation5 + $0x4] sm:$0x3] %vm98_vm0, %v92_v8  ;;  %v94_v16 = vadd.f32 %v128_v13, %v30_v11 }
  0x14   :  { %v95_v17 = vadd.f32 %v129_v15, %v31_v14  ;;  %v32_v18 = vld [vmem:[#allocation2 + $0xc] sm:$0x3]  ;;  %v130_v19 = vld [vmem:[%s247_s1 + $0x6] ss:$0 sm:$0xff]  ;;  %v33_v20 = vld [vmem:[#allocation2 + $0xe] sm:$0x3] }
  0x15   :  { %102 = vst.msk [vmem:[#allocation5 + $0x6] sm:$0x3] %vm98_vm0, %v93_v12  ;;  %v96_v21 = vadd.f32 %v130_v19, %v32_v18  ;;  %v131_v22 = vld [vmem:[%s247_s1 + $0x7] ss:$0 sm:$0xff]  ;;  %103 = vst.msk [vmem:[#allocation5 + $0x8] sm:$0x3] %vm98_vm0, %v94_v16 }
  0x16   :  { %104 = vst.msk [vmem:[#allocation5 + $0xa] sm:$0x3] %vm98_vm0, %v95_v17  ;;  %v97_v23 = vadd.f32 %v131_v22, %v33_v20  ;;  %s156_s5 = scalar_lea.vmem %s113_s17, 256 }
  0x17   :  { %105 = vst.msk [vmem:[#allocation5 + $0xc] sm:$0x3] %vm98_vm0, %v96_v21  ;;  %p157_p5 = scmp.ne.s32.totalorder %s113_s17, %s156_s5  ;;  %p162_p7 = scmp.lt.s32.totalorder %s156_s5, %s156_s5 }
  0x18   :  { %106 = vst.msk [vmem:[#allocation5 + $0xe] sm:$0x3] %vm98_vm0, %v97_v23 }
  0x19   :  { %p163_p8 = por %p162_p7, %p161_p6 }
  0x1b   :  { %p164_p9 = pnand %p163_p8, %p157_p5 }
  0x1d   :  { %167 = shalt.err (!%p164_p9)
}
  0x1e   :  { %118 = dma.vmem_to_hbm [thread:$0]  %s113_s17, 256, %s248_s2, [#allocation4], %s181_s12, %s181_s12, %s182_s13  }
  0x1f   :  { %178 = dma.done.wait [#allocation4], 256  }
  0x20   :  { %179 = vsyncadd [#allocation4], 4294967040 }
  0x21   :  { %122 = vsyncpa [#allocation3], 1 }
  0x22   :  { %123 = vsyncpa [#allocation4], 1 }

</bundles_post_ra>
